<compile_context>
chip_gen: v6e
topology: v6e:2x2x1
jax: 0.10.0
libtpu: 0.0.40
codegen_flags: <defaults>
</compile_context>

<pallas_src>
import jax
import jax.numpy as jnp
from jax import lax
from jax.experimental import pallas as pl
from jax.experimental.pallas import tpu as pltpu

EPS = 1e-5
NEG_SLOPE = 0.2
LANE = 128
SUBLANE = 8
VMEM_BUDGET = 24 << 20       # per-call working-set target (fits v7x 64 MiB/TC)
VMEM_LIMIT_CAP = 32 << 20    # never request more scoped VMEM than this


def _cdiv(a, b):
    return -(-a // b)


def _round_up(x, m):
    return _cdiv(x, m) * m


def _vmem_limit(footprint_bytes):
    return int(min(max(footprint_bytes + (2 << 20), 4 << 20), VMEM_LIMIT_CAP))


# ---------- Pass 1: conv tile (MXU) + per-tile BN partial statistics ----------
def _conv_stats_kernel(p_ref, w_ref, y_ref, st_ref):
    # p_ref : [TM, Kp] bf16 im2col patches tile
    # w_ref : [Kp, Cp] bf16 reshaped conv weight (grid-invariant)
    # y_ref : [TM, Cp] bf16 raw conv output tile (halved HBM round trip)
    # st_ref: [8,  Cp] f32 partial stats (row0=sum, row1=sum of squares)
    y = jnp.dot(p_ref[...], w_ref[...], preferred_element_type=jnp.float32)
    # Stats from the f32 MXU accumulator, before the bf16 cast.
    st_ref[0:1, :] = jnp.sum(y, axis=0, keepdims=True)
    st_ref[1:2, :] = jnp.sum(y * y, axis=0, keepdims=True)
    y_ref[...] = y.astype(y_ref.dtype)


# ---------- Pass 2: folded BN affine (scale/shift) + LeakyReLU ----------------
def _scale_shift_lrelu_kernel(y_ref, sc_ref, sh_ref, o_ref):
    z = y_ref[...].astype(jnp.float32) * sc_ref[...] + sh_ref[...]
    o_ref[...] = jnp.where(z >= 0, z, NEG_SLOPE * z).astype(o_ref.dtype)


# ---------- norm=False path: conv + LeakyReLU fused ---------------------------
def _conv_lrelu_kernel(p_ref, w_ref, o_ref):
    y = jnp.dot(p_ref[...], w_ref[...], preferred_element_type=jnp.float32)
    o_ref[...] = jnp.where(y >= 0, y, NEG_SLOPE * y).astype(o_ref.dtype)


def _im2col(x, k=4, stride=2, pad=1):
    # x: [N, C, H, W] -> patches [N*Ho*Wo, C*k*k], K ordered as (c, kh, kw)
    # (matches PyTorch OIHW weight flatten). x is already bf16 here so the
    # 4x-expanded patches intermediate is bf16 end-to-end.
    n, c, h, w = x.shape
    ho = (h + 2 * pad - k) // stride + 1
    wo = (w + 2 * pad - k) // stride + 1
    xp = jnp.pad(x, ((0, 0), (0, 0), (pad, pad), (pad, pad)))
    xp = xp.transpose(0, 2, 3, 1)                 # N, H+2p, W+2p, C
    cols = []
    for kh in range(k):
        for kw in range(k):
            cols.append(xp[:, kh:kh + stride * ho:stride,
                           kw:kw + stride * wo:stride, :])   # [N, Ho, Wo, C]
    patches = jnp.stack(cols, axis=-1)            # [N, Ho, Wo, C, k*k]
    return patches.reshape(n * ho * wo, c * k * k), (n, ho, wo)


def _choose_conv_tiles(m8, kp, cp, tm_target, y_bytes):
    # Double-buffered per-row footprint: bf16 patches row + y row.
    per_row = 2 * (kp * 2 + cp * y_bytes)
    fixed = 2 * (kp * cp * 2) + 2 * (8 * cp * 4)   # weight + stats buffers
    tm_cap = max(SUBLANE, (VMEM_BUDGET - fixed) // max(per_row, 1))
    tm_t = max(SUBLANE, min(tm_target, tm_cap, m8))
    # >= 2 grid steps so v7x's second TensorCore is used even on small images.
    min_tiles = 2 if m8 >= 2 * SUBLANE else 1
    num_tiles = max(min_tiles, _cdiv(m8, tm_t))
    tm = _round_up(_cdiv(m8, num_tiles), SUBLANE)  # snap: minimal padding
    m_pad = num_tiles * tm
    return tm, num_tiles, m_pad


def _choose_pass2_group(num_tiles, tm, cp, target_rows=4096):
    # Group pass-1 tiles into bigger elementwise tiles for pass 2.
    per_row = 2 * cp * (2 + 4)   # bf16 in + f32 out, double buffered
    best = 1
    for g in range(1, num_tiles + 1):
        if num_tiles % g:
            continue
        if tm * g > target_rows:
            break
        if tm * g * per_row + (1 << 20) > VMEM_BUDGET:
            break
        if num_tiles // g < min(2, num_tiles):   # keep >= 2 grid steps
            break
        best = g
    return best


def discr_block_forward(x, conv_weight, gamma=None, beta=None, norm=True,
                        tm_target=1024):
    """x: [N, Cin, H, W] f32, conv_weight: [Cout, Cin, 4, 4] (PyTorch layout)."""
    cout = conv_weight.shape[0]
    # TODO(synk): replace the materialized im2col with an implicit GEMM
    # (per-tap accumulation over the padded NHWC input in-kernel) to remove
    # this intermediate's HBM traffic entirely.
    patches, (n, ho, wo) = _im2col(x.astype(jnp.bfloat16))
    m, k = patches.shape

    kp = _round_up(k, LANE)
    cp = _round_up(cout, LANE)
    m8 = _round_up(m, SUBLANE)
    y_bytes = 2 if norm else 4
    tm, num_tiles, m_pad = _choose_conv_tiles(m8, kp, cp, tm_target, y_bytes)

    if m_pad != m or kp != k:
        patches = jnp.pad(patches, ((0, m_pad - m), (0, kp - k)))
    w_mat = conv_weight.reshape(cout, k).T.astype(jnp.bfloat16)      # [K, Cout]
    w_pad = jnp.pad(w_mat, ((0, kp - k), (0, cp - cout)))            # [Kp, Cp]

    flops = 2 * m_pad * kp * cp
    bytes_acc = (m_pad * kp * 2 + kp * cp * 2 + m_pad * cp * y_bytes
                 + (num_tiles * 8 * cp * 4 if norm else 0))
    footprint1 = (2 * (tm * kp * 2 + tm * cp * y_bytes + 8 * cp * 4)
                  + 2 * kp * cp * 2)
    cparams1 = pltpu.CompilerParams(
        dimension_semantics=("parallel",),
        vmem_limit_bytes=_vmem_limit(footprint1))
    cost = pl.CostEstimate(flops=flops, transcendentals=0,
                           bytes_accessed=bytes_acc)

    if norm:
        # ---- pass 1: conv + per-tile partial sums (pipelined over M) --------
        y, partial = pl.pallas_call(
            _conv_stats_kernel,
            out_shape=(jax.ShapeDtypeStruct((m_pad, cp), jnp.bfloat16),
                       jax.ShapeDtypeStruct((num_tiles * 8, cp), jnp.float32)),
            grid=(num_tiles,),
            in_specs=[pl.BlockSpec((tm, kp), lambda i: (i, 0)),
                      # Grid-invariant weight. TODO(synk): single-buffer it
                      # (pipeline_mode=pl.Buffered(1)) once verified on Mosaic
                      # to save one Kp x Cp VMEM buffer for deep layers.
                      pl.BlockSpec((kp, cp), lambda i: (0, 0))],
            out_specs=(pl.BlockSpec((tm, cp), lambda i: (i, 0)),
                       pl.BlockSpec((8, cp), lambda i: (i, 0))),
            compiler_params=cparams1,
            cost_estimate=cost,
        )(patches, w_pad)

        # ---- tiny cross-tile reduction + fold BN into scale/shift (JAX) -----
        st = partial.reshape(num_tiles, 8, cp)
        s = jnp.sum(st[:, 0, :], axis=0)
        ss = jnp.sum(st[:, 1, :], axis=0)
        mean = s / m                                   # real count (pad rows = 0)
        var = jnp.maximum(ss / m - mean * mean, 0.0)   # biased var (PyTorch train)
        inv = lax.rsqrt(var + EPS)
        gpad = jnp.pad(gamma.astype(jnp.float32), (0, cp - cout),
                       constant_values=1.0)
        bpad = jnp.pad(beta.astype(jnp.float32), (0, cp - cout))
        scale = (gpad * inv).reshape(1, cp)
        shift = (bpad - mean * gpad * inv).reshape(1, cp)

        # ---- pass 2: elementwise normalize + LeakyReLU (bigger M tiles) -----
        grp = _choose_pass2_group(num_tiles, tm, cp)
        tm2, nt2 = tm * grp, num_tiles // grp
        footprint2 = 2 * tm2 * cp * (2 + 4) + 4 * cp * 4
        out_pad = pl.pallas_call(
            _scale_shift_lrelu_kernel,
            out_shape=jax.ShapeDtypeStruct((m_pad, cp), jnp.float32),
            grid=(nt2,),
            in_specs=[pl.BlockSpec((tm2, cp), lambda i: (i, 0)),
                      pl.BlockSpec((1, cp), lambda i: (0, 0)),
                      pl.BlockSpec((1, cp), lambda i: (0, 0))],
            out_specs=pl.BlockSpec((tm2, cp), lambda i: (i, 0)),
            compiler_params=pltpu.CompilerParams(
                dimension_semantics=("parallel",),
                vmem_limit_bytes=_vmem_limit(footprint2)),
        )(y, scale, shift)
    else:
        out_pad = pl.pallas_call(
            _conv_lrelu_kernel,
            out_shape=jax.ShapeDtypeStruct((m_pad, cp), jnp.float32),
            grid=(num_tiles,),
            in_specs=[pl.BlockSpec((tm, kp), lambda i: (i, 0)),
                      pl.BlockSpec((kp, cp), lambda i: (0, 0))],
            out_specs=pl.BlockSpec((tm, cp), lambda i: (i, 0)),
            compiler_params=cparams1,
            cost_estimate=cost,
        )(patches, w_pad)

    out = out_pad[:m, :cout].reshape(n, ho, wo, cout)
    # TODO(synk): when chaining discr_blocks, keep the padded (M, Cp) NHWC
    # layout (and bf16) between layers and skip this slice + NCHW transpose;
    # both are full output-sized HBM copies.
    return out.transpose(0, 3, 1, 2)


def _reference(x, conv_weight, gamma, beta, norm=True):
    # Pure-JAX reference mirroring the kernel's bf16 operands and bf16 conv
    # intermediate (accumulation and BN statistics stay f32 in both).
    xb = x.astype(jnp.bfloat16).astype(jnp.float32)
    wb = conv_weight.astype(jnp.bfloat16).astype(jnp.float32)
    y = lax.conv_general_dilated(
        xb, wb, window_strides=(2, 2), padding=((1, 1), (1, 1)),
        dimension_numbers=("NCHW", "OIHW", "NCHW"))
    if norm:
        mean = jnp.mean(y, axis=(0, 2, 3), keepdims=True)
        var = jnp.mean((y - mean) ** 2, axis=(0, 2, 3), keepdims=True)
        yb = y.astype(jnp.bfloat16).astype(jnp.float32)   # mirror bf16 y store
        y = ((yb - mean) * lax.rsqrt(var + EPS) * gamma.reshape(1, -1, 1, 1)
             + beta.reshape(1, -1, 1, 1))
    return jnp.where(y >= 0, y, NEG_SLOPE * y)


if __name__ == "__main__":
    key = jax.random.PRNGKey(0)
    k_x, k_w, k_g, k_b = jax.random.split(key, 4)

    N, CIN, COUT, H, W = 2, 4, 8, 16, 16
    x = jax.random.normal(k_x, (N, CIN, H, W), dtype=jnp.float32)
    conv_w = 0.1 * jax.random.normal(k_w, (COUT, CIN, 4, 4), dtype=jnp.float32)
    gamma = 0.5 + jax.random.uniform(k_g, (COUT,), dtype=jnp.float32)
    beta = 0.1 * jax.random.normal(k_b, (COUT,), dtype=jnp.float32)

    # norm=True path (Conv -> BatchNorm(train) -> LeakyReLU)
    out = jax.block_until_ready(discr_block_forward(x, conv_w, gamma, beta, norm=True))
    ref = jax.block_until_ready(_reference(x, conv_w, gamma, beta, norm=True))
    assert out.shape == (N, COUT, H // 2, W // 2)
    assert jnp.allclose(out, ref, atol=2e-2, rtol=2e-2), \
        float(jnp.max(jnp.abs(out - ref)))

    # norm=False path (Conv -> LeakyReLU)
    out2 = jax.block_until_ready(discr_block_forward(x, conv_w, norm=False))
    ref2 = jax.block_until_ready(_reference(x, conv_w, gamma, beta, norm=False))
    assert out2.shape == (N, COUT, H // 2, W // 2)
    assert jnp.allclose(out2, ref2, atol=2e-2, rtol=2e-2), \
        float(jnp.max(jnp.abs(out2 - ref2)))

    print("KERNEL_OK")
</pallas_src>

<mosaic_0001>
module attributes {stable_mosaic.version = 11 : i64} {
  func.func @_conv_stats_kernel(%arg0: i32, %arg1: memref<64x128xbf16, #tpu.memory_space<vmem>>, %arg2: memref<128x128xbf16, #tpu.memory_space<vmem>>, %arg3: memref<64x128xbf16, #tpu.memory_space<vmem>>, %arg4: memref<8x128xf32, #tpu.memory_space<vmem>>) attributes {dimension_semantics = [#tpu.dimension_semantics<parallel>], iteration_bounds = array<i64: 2>, scalar_prefetch = 0 : i64, scratch_operands = 0 : i64, tpu.core_type = #tpu.core_type<tc>, window_params = [{transform_indices = @transform_0, window_bounds = array<i64: 64, 128>}, {pipeline_mode = #tpu.pipeline_mode<synchronous>, transform_indices = @transform_1, window_bounds = array<i64: 128, 128>}, {transform_indices = @transform_2, window_bounds = array<i64: 64, 128>}, {transform_indices = @transform_3, window_bounds = array<i64: 8, 128>}]} {
    %c0 = arith.constant 0 : index
    %c0_0 = arith.constant 0 : index
    %0 = vector.load %arg1[%c0, %c0_0] : memref<64x128xbf16, #tpu.memory_space<vmem>>, vector<64x128xbf16>
    %c0_1 = arith.constant 0 : index
    %c0_2 = arith.constant 0 : index
    %1 = vector.load %arg2[%c0_1, %c0_2] : memref<128x128xbf16, #tpu.memory_space<vmem>>, vector<128x128xbf16>
    %cst = arith.constant dense<0.000000e+00> : vector<64x128xf32>
    %2 = tpu.matmul %0, %1, %cst {dimension_numbers = #tpu.dot_dimension_numbers<[1], [0], [0], [1], [0, 0, 1, 1], [], []>} : vector<64x128xbf16>, vector<128x128xbf16>, vector<64x128xf32> -> vector<64x128xf32>
    %cst_3 = arith.constant dense<0.000000e+00> : vector<128xf32>
    %3 = vector.multi_reduction <add>, %2, %cst_3 [0] : vector<64x128xf32> to vector<128xf32>
    %4 = vector.shape_cast %3 : vector<128xf32> to vector<1x128xf32>
    %c0_4 = arith.constant 0 : index
    %c0_5 = arith.constant 0 : index
    %5 = vector.load %arg4[%c0_4, %c0_5] : memref<8x128xf32, #tpu.memory_space<vmem>>, vector<1x128xf32>
    tpu.vector_store %arg4[%c0_4, %c0_5], %4 {strides = array<i32>} : memref<8x128xf32, #tpu.memory_space<vmem>>, vector<1x128xf32>,
    %6 = arith.mulf %2, %2 : vector<64x128xf32>
    %cst_6 = arith.constant dense<0.000000e+00> : vector<128xf32>
    %7 = vector.multi_reduction <add>, %6, %cst_6 [0] : vector<64x128xf32> to vector<128xf32>
    %8 = vector.shape_cast %7 : vector<128xf32> to vector<1x128xf32>
    %c1 = arith.constant 1 : index
    %c0_7 = arith.constant 0 : index
    %9 = vector.load %arg4[%c1, %c0_7] : memref<8x128xf32, #tpu.memory_space<vmem>>, vector<1x128xf32>
    tpu.vector_store %arg4[%c1, %c0_7], %8 {strides = array<i32>} : memref<8x128xf32, #tpu.memory_space<vmem>>, vector<1x128xf32>,
    %10 = arith.truncf %2 : vector<64x128xf32> to vector<64x128xbf16>
    %c0_8 = arith.constant 0 : index
    %c0_9 = arith.constant 0 : index
    %11 = vector.load %arg3[%c0_8, %c0_9] : memref<64x128xbf16, #tpu.memory_space<vmem>>, vector<64x128xbf16>
    tpu.vector_store %arg3[%c0_8, %c0_9], %10 {strides = array<i32>} : memref<64x128xbf16, #tpu.memory_space<vmem>>, vector<64x128xbf16>,
    return
  }
  func.func @transform_0(%arg0: i32) -> (i32, i32) {
    %c0_i32 = arith.constant 0 : i32
    %c0_i32_0 = arith.constant 0 : i32
    return %arg0, %c0_i32 : i32, i32
  }
  func.func @transform_1(%arg0: i32) -> (i32, i32) {
    %c0_i32 = arith.constant 0 : i32
    %c0_i32_0 = arith.constant 0 : i32
    %c0_i32_1 = arith.constant 0 : i32
    return %c0_i32, %c0_i32_0 : i32, i32
  }
  func.func @transform_2(%arg0: i32) -> (i32, i32) {
    %c0_i32 = arith.constant 0 : i32
    %c0_i32_0 = arith.constant 0 : i32
    return %arg0, %c0_i32 : i32, i32
  }
  func.func @transform_3(%arg0: i32) -> (i32, i32) {
    %c0_i32 = arith.constant 0 : i32
    %c0_i32_0 = arith.constant 0 : i32
    return %arg0, %c0_i32 : i32, i32
  }
}

</mosaic_0001>

<bundles_post_ra>
// kernel: tpu_custom_call.1
= control target key start
LH: loop header
LB: loop body
LE: loop exit
PB: predicated region body
PF: predicated region fallthrough
CT: control target
= control target key end

     0   :  { %9 = vsyncpa [#allocation3], 0  ;;  %s1203_s0 = inlined_call_operand.hbm [shape: bf16[128,128], index: 0, kind: input, shape index: {}]   ;;  %s1204_s1 = inlined_call_operand.hbm [shape: bf16[128,128], index: 1, kind: input, shape index: {}]   ;;  %s1205_s2 = inlined_call_operand.hbm [shape: bf16[128,128], index: 2, kind: output, shape index: {0}]   ;;  %s1206_s3 = inlined_call_operand.hbm [shape: f32[16,128], index: 3, kind: output, shape index: {1}]  }
   0x1   :  { %11 = vsyncpa [#allocation3 + $0x1], 0 }
   0x2   :  { %12 = vsyncpa [#allocation6], 0 }
   0x3   :  { %13 = vsyncpa [#allocation4], 0 }
   0x4   :  { %15 = vsyncpa [#allocation4 + $0x1], 0 }
   0x5   :  { %16 = vsyncpa [#allocation9], 0 }
   0x6   :  { %18 = vsyncpa [#allocation9 + $0x1], 0  ;;  %s986_s12 = smov 0   ;;  %s988_s13 = smov 0  }
   0x7   :  { %s990_s14 = smov 0   ;;  %s992_s15 = smov 0  }
   0x8 LB: > { %s1007_s16 = sadd.s32 4294967295, %s956_s15   ;;  %s602_s17 = sadd.s32 4294967294, %s956_s15   ;;  %s956_s15 = sphi %s992_s15, %s1228_s15   ;;  %s952_s14 = sphi %s990_s14, %s1227_s14   ;;  %s948_s13 = sphi %s988_s13, %s1226_s13   ;;  %s944_s12 = sphi %s986_s12, %s1225_s12  }
   0x9   : > { %p44_p0 = scmp.ne.s32.totalorder %s948_s13, %s944_s12  ;;  %p1207_p1 = scmp.eq.s32.totalorder %s1007_s16, 0 }
   0xa   : > { %p95_p3 = scmp.eq.s32.totalorder %s602_s17, 1  ;;  %p603_p5 = scmp.ge.s32.totalorder %s956_s15, 1 }
   0xb   : > { %p1016_p4 = por %p1207_p1, %p44_p0  ;;  %p128_p7 = scmp.lt.s32.totalorder %s956_s15, 3 }
   0xc   : > { %p1021_p6 = por %p95_p3, %p44_p0  ;;  %s958_s21 = smov [#allocation5]  }
   0xd   : > { %s1211_s18 = scalar_select %p1016_p4, 1, 0 }
   0xe   : > { %s1212_s19 = scalar_select %p1021_p6, 1, 0 }
   0xf   : > { %p1026_p8 = pnand %p603_p5, %p128_p7  ;;  %s140_s22 = sshll.u32 %s958_s21, 4  ;;  %s141_s22 = int_to_ptr.vmem [resolvable:$true] %s140_s22 }
  0x10   : > { %s1040_s24 = sadd.s32 1, %s956_s15   ;;  %s31_s25 = sadd.s32 1, %s952_s14 }
  0x11   : > { %s1213_s20 = scalar_select %p1026_p8, 1, 0 }
  0x12   : > { %p736_p9 = pneg %p1026_p8  ;;  %s28_s26 = ssub.s32 %s956_s15, %s1040_s24 }
  0x13   : > { %s815_s27 = scalar_lea.vmem %s141_s22, 1024  ;;  %p823_p5 = scmp.lt.s32.totalorder %s141_s22, %s141_s22 }
  0x14   : > { %p1035_p11 = pnand %p736_p9, %p1207_p1  ;;  %p816_p13 = scmp.ne.s32.totalorder %s141_s22, %s815_s27 }
  0x15   : > { %p824_p7 = scmp.lt.s32.totalorder %s815_s27, %s815_s27 }
  0x16   : > { %p806_p12 = pneg %p1035_p11 }
  0x17   : > { %p825_p10 = por %p824_p7, %p823_p5 }
  0x18   : > { %p818_p0 = pnand %p816_p13, %p806_p12 }
  0x1a   : > { %p819_p3 = pneg %p818_p0 }
  0x1c   : > { %p826_p2 = pnand %p825_p10, %p819_p3 }
  0x1e   : > { %829 = shalt.err (!%p826_p2)
}
  0x1f   : > { %s959_s28 = smov 64   ;;  %s960_s29 = smov 4  }
  0x20   : > { %739 = dma.hbm_to_vmem [thread:$0]  (!%p1035_p11), %s1204_s1, 1024, %s141_s22, [#allocation6], %s959_s28, %s959_s28, %s960_s29  }
  0x21   : > { %p29_p2 = scmp.eq.s32.totalorder %s28_s26, 0  ;;  %p38_p9 = scmp.ne.s32.totalorder %s952_s14, %s948_s13 }
  0x22   : > { %p39_p10 = scmp.eq.s32.totalorder %s956_s15, 0  ;;  %p752_p12 = scmp.lt.s32.totalorder %s956_s15, 2 }
  0x23   : > { %s1060_s5 = scalar_select %p29_p2, %s952_s14, %s31_s25  }
  0x24   : > { %p40_p13 = por %p39_p10, %p38_p9  ;;  %p1215_p0 = scmp.eq.s32.totalorder %s1007_s16, 1 }
  0x25   : > { %s154_s7 = sand.u32 1, %s952_s14   ;;  %s641_s8 = sshll.u32 %s956_s15, 9 }
  0x26   : > { %p1064_p3 = por %p1215_p0, %p38_p9  ;;  %s606_s9 = sshll.u32 %s154_s7, 5 }
  0x27   : > { %s1073_s17 = scalar_lea.hbm %s1203_s0, %s641_s8  ;;  %s158_s21 = scalar_lea.vmem [#allocation2], %s606_s9 }
  0x28   : > { %s1216_s6 = scalar_select %p1064_p3, 1, 0 }
  0x29   : > { %s165_s22 = sshll.u32 %s158_s21, 4  ;;  %p1075_p11 = pnand %p752_p12, %p40_p13  ;;  %s1079_s22 = int_to_ptr.vmem [resolvable:$true] %s165_s22 }
  0x2a   : > { %s1081_s25 = scalar_lea.sflag [#allocation3], %s154_s7  ;;  %s830_s26 = scalar_lea.hbm %s1073_s17, 512 }
  0x2b   : > { %p831_p5 = scmp.ne.s32.totalorder %s1073_s17, %s830_s26  ;;  %p832_p7 = pneg %p1075_p11 }
  0x2c   : > { %s835_s4 = scalar_lea.hbm %s1203_s0, 1024  ;;  %p836_p10 = scmp.lt.s32.totalorder %s1073_s17, %s1203_s0 }
  0x2d   : > { %p833_p2 = pnand %p832_p7, %p831_p5  ;;  %p837_p12 = scmp.lt.s32.totalorder %s835_s4, %s830_s26 }
  0x2f   : > { %p834_p9 = pneg %p833_p2  ;;  %p838_p13 = por %p837_p12, %p836_p10 }
  0x31   : > { %p839_p0 = pnand %p838_p13, %p834_p9 }
  0x33   : > { %842 = shalt.err (!%p839_p0)
}
  0x34   : > { %s843_s7 = scalar_lea.vmem %s1079_s22, 512  ;;  %s961_s10 = smov [#allocation2]  }
  0x35   : > { %p844_p1 = scmp.ne.s32.totalorder %s1079_s22, %s843_s7  ;;  %s848_s11 = sshll.u32 %s961_s10, 4  ;;  %s849_s11 = int_to_ptr.vmem [resolvable:$false] %s848_s11 }
  0x36   : > { %s850_s21 = scalar_lea.vmem %s849_s11, 1024  ;;  %p851_p2 = scmp.lt.s32.totalorder %s1079_s22, %s849_s11 }
  0x37   : > { %p846_p6 = pnand %p844_p1, %p832_p7  ;;  %p852_p3 = scmp.lt.s32.totalorder %s850_s21, %s843_s7 }
  0x39   : > { %p847_p5 = pneg %p846_p6  ;;  %p853_p4 = por %p852_p3, %p851_p2 }
  0x3b   : > { %p854_p8 = pnand %p853_p4, %p847_p5 }
  0x3d   : > { %857 = shalt.err (!%p854_p8)
}
  0x3e   : > { %743 = dma.hbm_to_vmem [thread:$0]  (!%p1075_p11), %s1073_s17, 512, %s1079_s22, %s1081_s25, %s959_s28, %s959_s28, %s960_s29  }
  0x3f   : > { %p1218_p1 = scmp.ne.s32.totalorder %s1213_s20, 0 }
  0x40   : > { %s1108_s26 = sand.u32 (!%p1218_p1), 1, %s948_s13   ;;  %p1219_p4 = scmp.ne.s32.totalorder (!%p1218_p1), %s1211_s18, 0 }
  0x41   : > { %177 = sbr.rel (%p1218_p1) target bundleno = 357 (0x165), region = 28  ;;  %s610_s27 = sshll.u32 (!%p1218_p1), %s1108_s26, 5 }
  0x42   : > { %s180_s30 = scalar_lea.sflag (!%p1218_p1), [#allocation3], %s1108_s26  ;;  %s1114_s23 = scalar_lea.vmem (!%p1218_p1), [#allocation2], %s610_s27 }
  0x46   : > { %927 = dma.done.wait (%p1219_p4), %s180_s30, 512  }
  0x47   : > { %929 = vsyncadd (%p1219_p4), %s180_s30, 4294966784  ;;  %p1220_p6 = scmp.eq.s32.totalorder %s1007_s16, 0 }
  0x49   : > { %931 = dma.done.wait (%p1220_p6), [#allocation6], 1024   ;;  %p1221_p8 = pmov %p1220_p6 }
  0x4a   : > { %v792_v0 = vld [vmem:[#allocation5 + $0x38] sm:$0xff]   ;;  %v793_v1 = vld [vmem:[#allocation5 + $0x30] sm:$0xff]   ;;  %v794_v2 = vld [vmem:[#allocation5 + $0x28] sm:$0xff]   ;;  %s207_s18 = scalar_lea.vmem [#allocation7], %s610_s27  ;;  %s650_s28 = sshll.u32 %s1007_s16, 9 }
  0x4b   : > { %933 = vsyncadd (%p1221_p8), [#allocation6], 4294966272  ;;  %686 = vmatprep.subr.bf16.mxu0 %v792_v0  ;;  %710 = vmatprep.subr.bf16.mxu1 %v792_v0  ;;  %v795_v3 = vld [vmem:[#allocation5 + $0x20] sm:$0xff]   ;;  %v802_v5 = vld [vmem:[%s1114_s23 + $0x10] sm:$0xff]   ;;  %s474_s20 = sshll.u32 %s207_s18, 4  ;;  %s1139_s22 = scalar_lea.hbm %s1205_s2, %s650_s28  ;;  %s1134_s20 = int_to_ptr.vmem [resolvable:$true] %s474_s20 }
  0x4c   : > { %687 = vmatpush3.bf16.msra.mxu0 %v792_v0  ;;  %718 = vmatpush3.bf16.msra.mxu1 %v792_v0  ;;  %v800_v4 = vld [vmem:[%s1114_s23] sm:$0xff]   ;;  %v796_v6 = vld [vmem:[#allocation5 + $0x18] sm:$0xff]   ;;  %v797_v7 = vld [vmem:[#allocation5 + $0x10] sm:$0xff]   ;;  %s456_s25 = scalar_lea.sflag [#allocation4], %s1108_s26  ;;  %s858_s4 = scalar_lea.vmem %s1134_s20, 512 }
  0x4d   : > { %688 = vmatprep.subr.bf16.mxu0 %v793_v1  ;;  %711 = vmatprep.subr.bf16.mxu1 %v793_v1  ;;  %v798_v8 = vld [vmem:[#allocation5 + $0x8] sm:$0xff]   ;;  %v799_v9 = vld [vmem:[#allocation5] sm:$0xff]   ;;  %v803_v11 = vld [vmem:[%s1114_s23 + $0x18] sm:$0xff]   ;;  %p859_p3 = scmp.ne.s32.totalorder %s1134_s20, %s858_s4  ;;  %p1222_p11 = scmp.ne.s32.totalorder %s1216_s6, 0 }
  0x4e   : > { %702 = vmatprep.mubr.bf16.mxu0 %v800_v4  ;;  %706 = vmatprep.mubr.bf16.mxu1 %v802_v5  ;;  %v801_v10 = vld [vmem:[%s1114_s23 + $0x8] sm:$0xff]   ;;  %s962_s8 = smov [#allocation7]  }
  0x4f   : > { %p860_p7 = pnand %p859_p3, %p1222_p11  ;;  %s862_s9 = sshll.u32 %s962_s8, 4  ;;  %s863_s9 = int_to_ptr.vmem [resolvable:$false] %s862_s9 }
  0x50   : > { %689 = vmatpush3.bf16.msra.mxu0 %v793_v1  ;;  %719 = vmatpush3.bf16.msra.mxu1 %v793_v1  ;;  %s864_s7 = scalar_lea.vmem %s863_s9, 1024  ;;  %p865_p10 = scmp.lt.s32.totalorder %s1134_s20, %s863_s9 }
  0x51   : > { %690 = vmatprep.subr.bf16.mxu0 %v794_v2  ;;  %712 = vmatprep.subr.bf16.mxu1 %v794_v2  ;;  %p861_p9 = pneg %p860_p7  ;;  %p866_p12 = scmp.lt.s32.totalorder %s864_s7, %s858_s4 }
  0x53   : > { %p867_p13 = por %p866_p12, %p865_p10 }
  0x54   : > { %691 = vmatpush3.bf16.msra.mxu0 %v794_v2  ;;  %720 = vmatpush3.bf16.msra.mxu1 %v794_v2 }
  0x55   : > { %692 = vmatprep.subr.bf16.mxu0 %v795_v3  ;;  %713 = vmatprep.subr.bf16.mxu1 %v795_v3  ;;  %p868_p0 = pnand %p867_p13, %p861_p9 }
  0x58   : > { %693 = vmatpush3.bf16.msra.mxu0 %v795_v3  ;;  %721 = vmatpush3.bf16.msra.mxu1 %v795_v3 }
  0x59   : > { %694 = vmatprep.subr.bf16.mxu0 %v796_v6  ;;  %714 = vmatprep.subr.bf16.mxu1 %v796_v6 }
  0x5c   : > { %695 = vmatpush3.bf16.msra.mxu0 %v796_v6  ;;  %722 = vmatpush3.bf16.msra.mxu1 %v796_v6 }
  0x5d   : > { %696 = vmatprep.subr.bf16.mxu0 %v797_v7  ;;  %715 = vmatprep.subr.bf16.mxu1 %v797_v7 }
  0x60   : > { %697 = vmatpush3.bf16.msra.mxu0 %v797_v7  ;;  %723 = vmatpush3.bf16.msra.mxu1 %v797_v7 }
  0x61   : > { %698 = vmatprep.subr.bf16.mxu0 %v798_v8  ;;  %716 = vmatprep.subr.bf16.mxu1 %v798_v8 }
  0x64   : > { %699 = vmatpush3.bf16.msra.mxu0 %v798_v8  ;;  %724 = vmatpush3.bf16.msra.mxu1 %v798_v8 }
  0x65   : > { %700 = vmatprep.subr.bf16.mxu0 %v799_v9  ;;  %717 = vmatprep.subr.bf16.mxu1 %v799_v9 }
  0x68   : > { %701 = vmatpush3.bf16.msra.mxu0 %v799_v9  ;;  %725 = vmatpush3.bf16.msra.mxu1 %v799_v9 }
  0x6b   : > { %703 = vmatmul.mubr.bf16.vlgmr.msra.gmra.mxu0 %v801_v10  ;;  %707 = vmatmul.mubr.bf16.vlgmr.msra.gmra.mxu1 %v803_v11 }
 0x12b   : > { %v704_v12 = vpop.f32.mrf.mxu0  ;;  %v1128_v13 = vpop.f32.mrf.mxu1 }
 0x12c   : > { %v395_v27 = vmul.f32 %v704_v12, %v704_v12 }
 0x12d   : > { %v348_v14 = vpop.f32.mrf.mxu0  ;;  %v364_v15 = vpop.f32.mrf.mxu1 }
 0x12e   : > { %v393_v22 = vmul.f32 %v348_v14, %v348_v14 }
 0x12f   : > { %v705_v16 = vpop.f32.mrf.mxu0  ;;  %v709_v17 = vpop.f32.mrf.mxu1 }
 0x130   : > { %v659_v18 = vpack.c.bf16 %v705_v16, %v704_v12  ;;  %v669_v19 = vpack.c.bf16 %v709_v17, %v1128_v13  ;;  %v396_v30 = vmul.f32 %v705_v16, %v705_v16 }
 0x131   : > { %v351_v20 = vpop.f32.mrf.mxu0  ;;  %v367_v21 = vpop.f32.mrf.mxu1 }
 0x132   : > { %671 = vst [vmem:[%s207_s18 + $0x8] sm:$0xff] %v659_v18   ;;  %v379_v23 = vadd.f32 %v351_v20, %v348_v14  ;;  %v394_v24 = vmul.f32 %v351_v20, %v351_v20  ;;  %v654_v25 = vpack.c.bf16 %v351_v20, %v348_v14  ;;  %673 = vst [vmem:[%s207_s18 + $0x18] sm:$0xff] %v669_v19  }
 0x133   : > { %v664_v26 = vpack.c.bf16 %v367_v21, %v364_v15 }
 0x134   : > { %v380_v28 = vadd.f32 %v704_v12, %v379_v23  ;;  %v401_v29 = vadd.f32 %v394_v24, %v393_v22  ;;  %655 = vst [vmem:[%s207_s18] sm:$0xff] %v654_v25  }
 0x135   : > { %672 = vst [vmem:[%s207_s18 + $0x10] sm:$0xff] %v664_v26  }
 0x136   : > { %v402_v31 = vadd.f32 %v401_v29, %v395_v27  ;;  %v381_v32 = vadd.f32 %v705_v16, %v380_v28 }
 0x137   : > { %871 = shalt.err (!%p868_p0)
}
 0x138   : > { %s872_s10 = scalar_lea.hbm %s1139_s22, 512  ;;  %s876_s27 = scalar_lea.hbm %s1205_s2, 1024 }
 0x139   : > { %p873_p5 = scmp.ne.s32.totalorder %s1139_s22, %s872_s10  ;;  %p877_p4 = scmp.lt.s32.totalorder %s1139_s22, %s1205_s2 }
 0x13a   : > { %p878_p6 = scmp.lt.s32.totalorder %s876_s27, %s872_s10 }
 0x13b   : > { %p874_p2 = pnand %p873_p5, %p1222_p11 }
 0x13c   : > { %p879_p8 = por %p878_p6, %p877_p4 }
 0x13d   : > { %p875_p1 = pneg %p874_p2 }
 0x13f   : > { %p880_p3 = pnand %p879_p8, %p875_p1 }
 0x141   : > { %883 = shalt.err (!%p880_p3)
}
 0x142   : > { %s963_s18 = smov 64   ;;  %s964_s28 = smov 4   ;;  %v397_v33 = vmul.f32 %v364_v15, %v364_v15  ;;  %v382_v34 = vadd.f32 %v381_v32, %v364_v15  ;;  %v403_v35 = vadd.f32 %v402_v31, %v396_v30  ;;  %v398_v37 = vmul.f32 %v367_v21, %v367_v21 }
 0x143   : > { %732 = dma.vmem_to_hbm [thread:$0]  (%p1222_p11), %s1134_s20, 512, %s1139_s22, %s456_s25, %s963_s18, %s963_s18, %s964_s28   ;;  %v399_v39 = vmul.f32 %v1128_v13, %v1128_v13  ;;  %v400_v42 = vmul.f32 %v709_v17, %v709_v17 }
 0x144   : > { %v383_v36 = vadd.f32 %v382_v34, %v367_v21  ;;  %v404_v38 = vadd.f32 %v403_v35, %v397_v33  ;;  %s613_s20 = sshll.u32 %s1108_s26, 3  ;;  %s638_s29 = sshll.u32 %s1007_s16, 7 }
 0x145   : > { %s214_s17 = scalar_lea.vmem [#allocation8], %s613_s20  ;;  %s488_s8 = scalar_lea.hbm %s1206_s3, %s638_s29 }
 0x146   : > { %v384_v40 = vadd.f32 %v1128_v13, %v383_v36  ;;  %v405_v41 = vadd.f32 %v404_v38, %v398_v37  ;;  %s490_s22 = sshll.u32 %s214_s17, 4  ;;  %s461_s9 = scalar_lea.sflag [#allocation9], %s1108_s26  ;;  %s491_s22 = int_to_ptr.vmem [resolvable:$true] %s490_s22 }
 0x147   : > { %s884_s7 = scalar_lea.vmem %s491_s22, 128  ;;  %s965_s10 = smov [#allocation8]  }
 0x148   : > { %v385_v43 = vadd.f32 %v709_v17, %v384_v40  ;;  %v406_v44 = vadd.f32 %v405_v41, %v399_v39  ;;  %p885_p7 = scmp.ne.s32.totalorder %s491_s22, %s884_s7  ;;  %s888_s16 = sshll.u32 %s965_s10, 4  ;;  %s889_s16 = int_to_ptr.vmem [resolvable:$false] %s888_s16 }
 0x149   : > { %s890_s11 = scalar_lea.vmem %s889_s16, 256  ;;  %p891_p12 = scmp.lt.s32.totalorder %s491_s22, %s889_s16 }
 0x14a   : > { %v386_v45 = vrot.slane %v385_v43, 4  ;;  %v407_v46 = vadd.f32 %v406_v44, %v400_v42  ;;  %p886_p9 = pnand %p885_p7, %p1222_p11  ;;  %p892_p13 = scmp.lt.s32.totalorder %s890_s11, %s884_s7 }
 0x14c   : > { %v387_v47 = vadd.f32 %v386_v45, %v385_v43  ;;  %v408_v48 = vrot.slane %v407_v46, 4  ;;  %p887_p10 = pneg %p886_p9  ;;  %p893_p0 = por %p892_p13, %p891_p12 }
 0x14e   : > { %v388_v49 = vrot.slane %v387_v47, 2  ;;  %v409_v50 = vadd.f32 %v408_v48, %v407_v46  ;;  %p894_p5 = pnand %p893_p0, %p887_p10 }
 0x150   : > { %v389_v51 = vadd.f32 %v388_v49, %v387_v47  ;;  %v410_v52 = vrot.slane %v409_v50, 2 }
 0x152   : > { %v390_v53 = vrot.slane %v389_v51, 1  ;;  %v411_v54 = vadd.f32 %v410_v52, %v409_v50 }
 0x154   : > { %v391_v55 = vadd.f32 %v390_v53, %v389_v51  ;;  %v412_v56 = vrot.slane %v411_v54, 1 }
 0x156   : > { %392 = vst [vmem:[%s214_s17] sm:$0x1] %v391_v55  ;;  %v413_v57 = vadd.f32 %v412_v56, %v411_v54 }
 0x158   : > { %414 = vst [vmem:[%s214_s17 + $0x1] sm:$0x1] %v413_v57 }
 0x159   : > { %897 = shalt.err (!%p894_p5)
}
 0x15a   : > { %s898_s21 = scalar_lea.hbm %s488_s8, 128  ;;  %s902_s30 = scalar_lea.hbm %s1206_s3, 256 }
 0x15b   : > { %p899_p2 = scmp.ne.s32.totalorder %s488_s8, %s898_s21  ;;  %p903_p6 = scmp.lt.s32.totalorder %s488_s8, %s1206_s3 }
 0x15c   : > { %p904_p8 = scmp.lt.s32.totalorder %s902_s30, %s898_s21 }
 0x15d   : > { %p900_p1 = pnand %p899_p2, %p1222_p11 }
 0x15e   : > { %p905_p3 = por %p904_p8, %p903_p6 }
 0x15f   : > { %p901_p4 = pneg %p900_p1 }
 0x161   : > { %p906_p7 = pnand %p905_p3, %p901_p4 }
 0x163   : > { %909 = shalt.err (!%p906_p7)
}
 0x164   : > { %733 = dma.vmem_to_hbm [thread:$0]  (%p1222_p11), %s491_s22, 128, %s488_s8, %s461_s9  }
 0x165 PF: > { %s502_s28 = sand.u32 1, %s944_s12   ;;  %p1223_p9 = scmp.ne.s32.totalorder %s1212_s19, 0 }
 0x166   : > { %p1224_p10 = scmp.ge.s32.totalorder %s956_s15, 2  ;;  %s503_s20 = scalar_lea.sflag [#allocation4], %s502_s28 }
 0x168   : > { %p745_p12 = pnand %p1224_p10, %p1223_p9 }
 0x16a   : > { %p746_p13 = pneg %p745_p12 }
 0x16c   : > { %935 = dma.done.wait (%p746_p13), %s503_s20, 512  }
 0x16d   : > { %937 = vsyncadd (%p746_p13), %s503_s20, 4294966784  ;;  %s512_s29 = scalar_lea.sflag [#allocation9], %s502_s28 }
 0x16e   : > { %939 = dma.done.wait (%p746_p13), %s512_s29, 128  }
 0x16f   : > { %941 = vsyncadd (%p746_p13), %s512_s29, 4294967168  ;;  %p21_p11 = scmp.ge.s32.totalorder %s1040_s24, 4   ;;  %s1225_s12 = smov %s948_s13 }
 0x170   : > { %s1226_s13 = smov %s952_s14  ;;  %s1227_s14 = smov %s1060_s5 }
 0x171   : > { %s1228_s15 = smov %s1040_s24  ;;  %23 = sbr.rel (!%p21_p11) target bundleno = 8 (0x8), region = 94 }
 0x176   :  { %517 = vsyncpa [#allocation3], 1 }
 0x177   :  { %519 = vsyncpa [#allocation3 + $0x1], 1 }
 0x178   :  { %520 = vsyncpa [#allocation6], 1 }
 0x179   :  { %521 = vsyncpa [#allocation4], 1 }
 0x17a   :  { %523 = vsyncpa [#allocation4 + $0x1], 1 }
 0x17b   :  { %524 = vsyncpa [#allocation9], 1 }
 0x17c   :  { %526 = vsyncpa [#allocation9 + $0x1], 1 }

</bundles_post_ra>
